<compile_context>
chip_gen: v5e
topology: v5e:2x2
jax: 0.10.0
libtpu: 0.0.40
codegen_flags: <defaults>
</compile_context>

<pallas_src>
import jax
import jax.numpy as jnp
from jax import lax
from jax.experimental import pallas as pl
from jax.experimental.pallas import tpu as pltpu


def _round_up(x, m):
    return (x + m - 1) // m * m


def _patch_embed_kernel(x_ref, w_ref, b_ref, o_ref):
    # x_ref: (tm, K) patch tile; w_ref: (K, tn) weight tile (VMEM-resident across
    # the inner M sweep); b_ref: (1, tn) f32 bias; o_ref: (tm, tn).
    acc = jnp.dot(x_ref[...], w_ref[...], preferred_element_type=jnp.float32)
    o_ref[...] = (acc + b_ref[...]).astype(o_ref.dtype)


def patch_embed(x, weight, bias, patch_size, *,
                compute_dtype=jnp.bfloat16, out_dtype=None,
                tm=512, tn_max=1024):
    """x: (B, C, H, W); weight: (E, C, ph, pw); bias: (E,) -> (B, N, E).

    compute_dtype: MXU operand dtype (bf16 default: full-rate MXU, half HBM bytes).
    out_dtype:     output dtype; defaults to compute_dtype (bandwidth win on
                   v6e/v7x).  Pass x.dtype for the exact PyTorch dtype behaviour.
    """
    B, C, H, W = x.shape
    E = weight.shape[0]
    ph, pw = patch_size
    assert H % ph == 0 and W % pw == 0, "img dims must be divisible by patch_size"
    Hp, Wp = H // ph, W // pw
    N = Hp * Wp
    M = B * N
    K = C * ph * pw

    if compute_dtype is None:
        compute_dtype = x.dtype
    if out_dtype is None:
        out_dtype = compute_dtype

    # --- glue: extract non-overlapping patches, flatten in (c, dh, dw) order to
    # match nn.Conv2d's OIHW weight layout.  One fused XLA transpose+convert copy;
    # no pad copy and (usually) no post-kernel de-pad copy.
    # TODO(synk): fuse this patchify into the kernel (manual DMA over NCHW row
    # strips) to drop one full-activation HBM round-trip on v6e/v7x; needs
    # multi-patch-row blocks to amortize per-step overhead without relying on
    # in-kernel 5-D transposes.
    xp = x.reshape(B, C, Hp, ph, Wp, pw)
    xp = jnp.transpose(xp, (0, 2, 4, 1, 3, 5)).reshape(M, K).astype(compute_dtype)

    # Weight/bias are tiny: pad E up to a lane multiple so output stores are dense.
    Ep = _round_up(E, 128)
    w2d = weight.reshape(E, K).T.astype(compute_dtype)           # (K, E)
    b2d = bias.astype(jnp.float32).reshape(1, E)                 # f32 bias add
    if Ep != E:
        w2d = jnp.pad(w2d, ((0, 0), (0, Ep - E)))
        b2d = jnp.pad(b2d, ((0, 0), (0, Ep - E)))

    # tn: largest 128-multiple (<= tn_max) that divides Ep.
    tn = 128
    for cand in range(_round_up(min(tn_max, Ep), 128), 0, -128):
        if Ep % cand == 0:
            tn = cand
            break
    grid_n = Ep // tn

    # tm: multiple of 8 (sublane); ragged last M tile is masked by Pallas.
    tm = max(8, min(_round_up(tm, 8), _round_up(M, 8)))
    if grid_n == 1 and pl.cdiv(M, tm) < 2 and M > 8:
        # Guarantee >= 2 grid tiles so both v7x TensorCores get work.
        tm = max(8, _round_up(pl.cdiv(M, 2), 8))
    grid_m = pl.cdiv(M, tm)

    bytes_accessed = (xp.size * xp.dtype.itemsize
                      + w2d.size * w2d.dtype.itemsize
                      + b2d.size * b2d.dtype.itemsize
                      + M * Ep * jnp.dtype(out_dtype).itemsize)

    out = pl.pallas_call(
        _patch_embed_kernel,
        out_shape=jax.ShapeDtypeStruct((M, Ep), out_dtype),
        grid_spec=pltpu.PrefetchScalarGridSpec(
            num_scalar_prefetch=0,
            # E axis outer, M axis inner: weight/bias blocks (indexed by j only)
            # are revisited (not re-DMA'd) across the whole inner M sweep.
            grid=(grid_n, grid_m),
            in_specs=[
                pl.BlockSpec((tm, K), lambda j, i: (i, 0)),
                pl.BlockSpec((K, tn), lambda j, i: (0, j)),
                pl.BlockSpec((1, tn), lambda j, i: (0, j)),
            ],
            out_specs=pl.BlockSpec((tm, tn), lambda j, i: (i, j)),
        ),
        compiler_params=pltpu.CompilerParams(
            dimension_semantics=("parallel", "parallel"),
            vmem_limit_bytes=64 * 1024 * 1024,
        ),
        cost_estimate=pl.CostEstimate(
            flops=2 * M * K * E,
            transcendentals=0,
            bytes_accessed=bytes_accessed,
        ),
    )(xp, w2d, b2d)

    if Ep != E:
        out = out[:, :E]
    return out.reshape(B, N, E)


def reference_patch_embed(x, weight, bias, patch_size):
    """Pure-JAX reference: strided conv, flatten(2), transpose(1,2)."""
    y = lax.conv_general_dilated(
        x, weight,
        window_strides=patch_size,
        padding="VALID",
        dimension_numbers=("NCHW", "OIHW", "NCHW"),
    )
    y = y + bias.reshape(1, -1, 1, 1)
    B, E, Hp, Wp = y.shape
    return jnp.transpose(y.reshape(B, E, Hp * Wp), (0, 2, 1))


if __name__ == "__main__":
    # Small, module-consistent shapes.
    B, C, H, W = 2, 4, 16, 16
    patch_size = (4, 4)
    embed_dim = 32

    key = jax.random.PRNGKey(0)
    kx, kw, kb = jax.random.split(key, 3)

    x = jax.random.normal(kx, (B, C, H, W), dtype=jnp.float32)
    # Deterministic synthetic init (shapes match nn.Conv2d(C, E, patch, stride=patch)).
    weight = jax.random.normal(kw, (embed_dim, C, patch_size[0], patch_size[1]),
                               dtype=jnp.float32) * 0.02
    bias = jax.random.normal(kb, (embed_dim,), dtype=jnp.float32) * 0.02

    ref = reference_patch_embed(x, weight, bias, patch_size)
    N = (H // patch_size[0]) * (W // patch_size[1])

    # Default path: bf16 MXU operands + bf16 stores, f32 accumulation/bias.
    out_bf16 = jax.block_until_ready(patch_embed(x, weight, bias, patch_size))
    assert out_bf16.shape == (B, N, embed_dim)
    assert out_bf16.dtype == jnp.bfloat16
    assert jnp.allclose(out_bf16.astype(jnp.float32), ref, atol=2e-2, rtol=2e-2)

    # Full-precision path (matches the PyTorch module's f32 output dtype).
    out_f32 = jax.block_until_ready(
        patch_embed(x, weight, bias, patch_size,
                    compute_dtype=jnp.float32, out_dtype=jnp.float32))
    assert out_f32.shape == (B, N, embed_dim)
    assert out_f32.dtype == jnp.float32
    assert jnp.allclose(out_f32, ref, atol=5e-3, rtol=5e-3)

    print("KERNEL_OK")
</pallas_src>

<mosaic_0001>
module attributes {stable_mosaic.version = 11 : i64} {
  func.func @_patch_embed_kernel(%arg0: i32, %arg1: i32, %arg2: memref<16x64xbf16, #tpu.memory_space<vmem>>, %arg3: memref<64x128xbf16, #tpu.memory_space<vmem>>, %arg4: memref<1x128xf32, #tpu.memory_space<vmem>>, %arg5: memref<16x128xbf16, #tpu.memory_space<vmem>>) attributes {dimension_semantics = [#tpu.dimension_semantics<parallel>, #tpu.dimension_semantics<parallel>], iteration_bounds = array<i64: 1, 2>, scalar_prefetch = 0 : i64, scratch_operands = 0 : i64, tpu.core_type = #tpu.core_type<tc>, window_params = [{transform_indices = @transform_0, window_bounds = array<i64: 16, 64>}, {transform_indices = @transform_1, window_bounds = array<i64: 64, 128>}, {transform_indices = @transform_2, window_bounds = array<i64: 1, 128>}, {transform_indices = @transform_3, window_bounds = array<i64: 16, 128>}]} {
    %c0 = arith.constant 0 : index
    %c0_0 = arith.constant 0 : index
    %0 = vector.load %arg2[%c0, %c0_0] : memref<16x64xbf16, #tpu.memory_space<vmem>>, vector<16x64xbf16>
    %c0_1 = arith.constant 0 : index
    %c0_2 = arith.constant 0 : index
    %1 = vector.load %arg3[%c0_1, %c0_2] : memref<64x128xbf16, #tpu.memory_space<vmem>>, vector<64x128xbf16>
    %cst = arith.constant dense<0.000000e+00> : vector<16x128xf32>
    %2 = tpu.matmul %0, %1, %cst {dimension_numbers = #tpu.dot_dimension_numbers<[1], [0], [0], [1], [0, 0, 1, 1], [], []>} : vector<16x64xbf16>, vector<64x128xbf16>, vector<16x128xf32> -> vector<16x128xf32>
    %c0_3 = arith.constant 0 : index
    %c0_4 = arith.constant 0 : index
    %3 = vector.load %arg4[%c0_3, %c0_4] : memref<1x128xf32, #tpu.memory_space<vmem>>, vector<1x128xf32>
    %4 = vector.broadcast %3 : vector<1x128xf32> to vector<16x128xf32>
    %5 = arith.addf %2, %4 : vector<16x128xf32>
    %6 = arith.truncf %5 : vector<16x128xf32> to vector<16x128xbf16>
    %c0_5 = arith.constant 0 : index
    %c0_6 = arith.constant 0 : index
    %7 = vector.load %arg5[%c0_5, %c0_6] : memref<16x128xbf16, #tpu.memory_space<vmem>>, vector<16x128xbf16>
    tpu.vector_store %arg5[%c0_5, %c0_6], %6 {strides = array<i32>} : memref<16x128xbf16, #tpu.memory_space<vmem>>, vector<16x128xbf16>,
    return
  }
  func.func @transform_0(%arg0: i32, %arg1: i32) -> (i32, i32) {
    %c0_i32 = arith.constant 0 : i32
    %c0_i32_0 = arith.constant 0 : i32
    return %arg1, %c0_i32 : i32, i32
  }
  func.func @transform_1(%arg0: i32, %arg1: i32) -> (i32, i32) {
    %c0_i32 = arith.constant 0 : i32
    %c0_i32_0 = arith.constant 0 : i32
    return %c0_i32, %arg0 : i32, i32
  }
  func.func @transform_2(%arg0: i32, %arg1: i32) -> (i32, i32) {
    %c0_i32 = arith.constant 0 : i32
    %c0_i32_0 = arith.constant 0 : i32
    return %c0_i32, %arg0 : i32, i32
  }
  func.func @transform_3(%arg0: i32, %arg1: i32) -> (i32, i32) {
    %c0_i32 = arith.constant 0 : i32
    return %arg1, %arg0 : i32, i32
  }
}

</mosaic_0001>

<bundles_post_ra>
// kernel: tpu_custom_call.1
= control target key start
LH: loop header
LB: loop body
LE: loop exit
PB: predicated region body
PF: predicated region fallthrough
CT: control target
= control target key end

     0   :  { %s895_s0 = inlined_call_operand.hbm [shape: bf16[32,64], index: 0, kind: input, shape index: {}]   ;;  %s896_s1 = inlined_call_operand.hbm [shape: bf16[64,128], index: 1, kind: input, shape index: {}]   ;;  %s897_s2 = inlined_call_operand.vmem [shape: f32[1,128], index: 2, kind: input, shape index: {}]   ;;  %s898_s3 = inlined_call_operand.hbm [shape: bf16[32,128], index: 3, kind: output, shape index: {}]  }
   0x1   :  { %900 = sst [smem:[#allocation11_spill]] %s896_s1 }
   0x2   :  { %8 = vsyncpa [#allocation3], 0 }
   0x3   :  { %10 = vsyncpa [#allocation3 + $0x1], 0 }
   0x4   :  { %11 = vsyncpa [#allocation6], 0 }
   0x5   :  { %12 = vsyncpa [#allocation4], 0 }
   0x6   :  { %14 = vsyncpa [#allocation4 + $0x1], 0  ;;  %s737_s12 = smov 0   ;;  %s739_s13 = smov 0  }
   0x7   :  { %s741_s14 = smov 0   ;;  %s743_s15 = smov 0  }
   0x8   :  { %s745_s16 = smov 0   ;;  %s747_s17 = smov 0  }
   0x9 LB: > { %s435_s18 = sadd.s32 4294967295, %s710_s17   ;;  %s436_s19 = sadd.s32 4294967294, %s710_s17   ;;  %s710_s17 = sphi %s747_s17, %s20_s17   ;;  %s706_s16 = sphi %s745_s16, %s914_s16   ;;  %s702_s15 = sphi %s743_s15, %s913_s15   ;;  %s698_s14 = sphi %s741_s14, %s912_s14   ;;  %s694_s13 = sphi %s739_s13, %s911_s13   ;;  %s690_s12 = sphi %s737_s12, %s910_s12  }
   0xa   : > { %p52_p0 = scmp.ne.s32.totalorder %s694_s13, %s690_s12  ;;  %p771_p1 = scmp.eq.s32.totalorder %s435_s18, 0 }
   0xb   : > { %p775_p2 = scmp.eq.s32.totalorder %s435_s18, 1  ;;  %p136_p3 = scmp.eq.s32.totalorder %s436_s19, 1 }
   0xc   : > { %p781_p4 = por %p771_p1, %p52_p0  ;;  %p437_p5 = scmp.ge.s32.totalorder %s710_s17, 1 }
   0xd   : > { %p786_p6 = por %p136_p3, %p52_p0  ;;  %p143_p7 = scmp.lt.s32.totalorder %s710_s17, 3 }
   0xe   : > { %s905_s1 = sld [smem:[#allocation11_spill]]  ;;  %s712_s28 = smov [#allocation5]  }
   0xf   : > { %p794_p8 = pnand %p437_p5, %p143_p7  ;;  %s158_s29 = sshll.u32 %s712_s28, 4  ;;  %s159_s29 = int_to_ptr.vmem [resolvable:$true] %s158_s29 }
  0x10   : > { %p440_p11 = scmp.ge.s32.totalorder %s710_s17, 2  ;;  %s899_s30 = smov 64  }
  0x11   : > { %p494_p9 = pneg %p794_p8  ;;  %s714_s4 = smov 4  }
  0x12   : > { %s29_s5 = sadd.s32 1, %s706_s16  ;;  %s39_s6 = sadd.s32 1, %s698_s14 }
  0x13   : > { %p495_p10 = pnand %p494_p9, %p771_p1  ;;  %p30_p12 = scmp.ge.s32.totalorder %s29_s5, 2 }
  0x14   : > { %s156_s26 = sshll.u32 %s905_s1, 4  ;;  %p46_p13 = scmp.ne.s32.totalorder %s698_s14, %s694_s13  ;;  %s157_s26 = int_to_ptr.hbm [resolvable:$true] %s156_s26 }
  0x15   : > { %497 = dma.hbm_to_vmem [thread:$0]  (!%p495_p10), %s157_s26, 512, %s159_s29, [#allocation6], %s899_s30, %s899_s30, %s714_s4  }
  0x16   : > { %p47_p0 = scmp.eq.s32.totalorder %s710_s17, 0  ;;  %s916_s5 = smov (%p30_p12, %s29_s5), 0 }
  0x17   : > { %p819_p5 = por %p775_p2, %p46_p13  ;;  %s36_s9 = ssub.s32 %s706_s16, %s916_s5 }
  0x18   : > { %p813_p3 = por %p47_p0, %p46_p13  ;;  %p507_p7 = scmp.lt.s32.totalorder %s710_s17, 2 }
  0x19   : > { %p37_p9 = scmp.eq.s32.totalorder %s36_s9, 0  ;;  %s178_s10 = sand.u32 1, %s698_s14  }
  0x1a   : > { %s441_s11 = sshll.u32 %s178_s10, 3  ;;  %s474_s19 = sshll.u32 %s706_s16, 3 }
  0x1b   : > { %s828_s18 = scalar_select %p37_p9, %s698_s14, %s39_s6  }
  0x1c   : > { %s187_s26 = scalar_lea.hbm %s895_s0, %s474_s19  ;;  %s182_s28 = scalar_lea.vmem [#allocation2], %s441_s11 }
  0x1d   : > { %s190_s29 = sshll.u32 %s182_s28, 4  ;;  %s188_s21 = sshll.u32 %s187_s26, 4  ;;  %s191_s29 = int_to_ptr.vmem [resolvable:$true] %s190_s29  ;;  %s189_s21 = int_to_ptr.hbm [resolvable:$true] %s188_s21 }
  0x1e   : > { %p499_p2 = pnand %p507_p7, %p813_p3  ;;  %s179_s30 = scalar_lea.sflag [#allocation3], %s178_s10 }
  0x1f   : > { %s909_s1 = smov 64   ;;  %202 = sbr.rel (%p794_p8) target bundleno = 197 (0xc5), region = 32 }
  0x20   : > { %501 = dma.hbm_to_vmem [thread:$0]  (!%p499_p2), %s189_s21, 128, %s191_s29, %s179_s30, %s909_s1, %s909_s1, %s714_s4  }
  0x21   : > { %s842_s6 = sand.u32 (!%p794_p8), 1, %s694_s13  }
  0x22   : > { %s445_s9 = sshll.u32 (!%p794_p8), %s842_s6, 3  ;;  %s205_s11 = scalar_lea.sflag (!%p794_p8), [#allocation3], %s842_s6 }
  0x23   : > { %s208_s19 = scalar_lea.vmem (!%p794_p8), [#allocation2], %s445_s9 }
  0x24   : > { %677 = dma.done.wait (%p781_p4), %s205_s11, 128  }
  0x25   : > { %679 = vsyncadd (%p781_p4), %s205_s11, 4294967168 }
  0x26   : > { %681 = dma.done.wait (%p771_p1), [#allocation6], 512  }
  0x27   : > { %683 = vsyncadd (%p771_p1), [#allocation6], 4294966784  ;;  %v479_v0 = vld [vmem:[#allocation5 + $0x18] sm:$0xff]  ;;  %v478_v1 = vld [vmem:[#allocation5 + $0x10] sm:$0xff]  ;;  %vm289_vm0 = vcmask 523264   ;;  %s480_s1 = sshll.u32 %s702_s15, 3 }
  0x28   : > { %297 = vmatpush.bf16.msra.mxu0 %v479_v0  ;;  %v477_v2 = vld [vmem:[#allocation5 + $0x8] sm:$0xff]  ;;  %v476_v3 = vld [vmem:[#allocation5] sm:$0xff]  ;;  %v475_v4 = vld [vmem:[%s208_s19] sm:$0xff]  ;;  %s324_s20 = scalar_lea.hbm %s898_s3, %s480_s1  ;;  %s239_s7 = scalar_lea.vmem [#allocation7], %s445_s9 }
  0x29   : > { %v563_v6 = vld [vmem:[%s897_s2] ss:$0 sm:$0xff]  ;;  %s325_s10 = sshll.u32 %s239_s7, 4  ;;  %s327_s24 = sshll.u32 %s324_s20, 4  ;;  %s326_s10 = int_to_ptr.vmem [resolvable:$true] %s325_s10  ;;  %s328_s24 = int_to_ptr.hbm [resolvable:$true] %s327_s24 }
  0x2a   : > { %s312_s15 = scalar_lea.sflag [#allocation4], %s842_s6  ;;  %s638_s25 = sshra.s32 %s328_s24, 4  ;;  %s639_s25 = int_to_ptr.hbm [resolvable:$true] %s638_s25 }
  0x2b   : > { %s640_s26 = scalar_lea.hbm %s639_s25, 8  ;;  %s644_s21 = scalar_lea.hbm %s898_s3, 16 }
  0x2c   : > { %298 = vmatpush.bf16.msra.mxu0 %v478_v1  ;;  %p641_p1 = scmp.ne.s32.totalorder %s639_s25, %s640_s26  ;;  %p645_p10 = scmp.lt.s32.totalorder %s639_s25, %s898_s3 }
  0x2d   : > { %p646_p12 = scmp.lt.s32.totalorder %s644_s21, %s640_s26 }
  0x2e   : > { %p642_p4 = pnand %p641_p1, %p819_p5 }
  0x2f   : > { %p647_p13 = por %p646_p12, %p645_p10 }
  0x30   : > { %299 = vmatpush.bf16.msra.mxu0 %v477_v2  ;;  %p643_p8 = pneg %p642_p4 }
  0x32   : > { %p648_p0 = pnand %p647_p13, %p643_p8 }
  0x34   : > { %300 = vmatpush.bf16.msra.mxu0 %v476_v3 }
  0x37   : > { %468 = vmatmul.msk.bf16.vlgmr.msra.gmra.mxu0 %vm289_vm0, %v475_v4 }
  0xb4   : > { %v302_v5 = vpop.f32.mrf.mxu0 }
  0xb5   : > { %v303_v8 = vadd.f32 %v563_v6, %v302_v5 }
  0xbc   : > { %v304_v7 = vpop.f32.mrf.mxu0 }
  0xbd   : > { %v305_v9 = vadd.f32 %v563_v6, %v304_v7 }
  0xbf   : > { %v484_v10 = vpack.c.bf16 %v305_v9, %v303_v8 }
  0xc1   : > { %485 = vst [vmem:[%s239_s7] sm:$0xff] %v484_v10  }
  0xc2   : > { %651 = shalt.err (!%p648_p0)
}
  0xc3   : > { %s715_s6 = smov 64   ;;  %s716_s19 = smov 4  }
  0xc4   : > { %492 = dma.vmem_to_hbm [thread:$0]  (%p819_p5), %s326_s10, 128, %s328_s24, %s312_s15, %s715_s6, %s715_s6, %s716_s19  }
  0xc5 PF: > { %s342_s1 = sand.u32 1, %s690_s12   ;;  %p503_p3 = pnand %p440_p11, %p786_p6 }
  0xc6   : > { %s343_s22 = scalar_lea.sflag [#allocation4], %s342_s1 }
  0xc7   : > { %p504_p7 = pneg %p503_p3 }
  0xc9   : > { %685 = dma.done.wait (%p504_p7), %s343_s22, 128  }
  0xca   : > { %687 = vsyncadd (%p504_p7), %s343_s22, 4294967168  ;;  %s20_s17 = sadd.s32 1, %s710_s17   ;;  %s910_s12 = smov %s694_s13 }
  0xcb   : > { %p17_p9 = scmp.ge.s32.totalorder %s20_s17, 4   ;;  %s911_s13 = smov %s698_s14 }
  0xcc   : > { %s912_s14 = smov %s828_s18  ;;  %s913_s15 = smov %s706_s16 }
  0xcd   : > { %s914_s16 = smov %s916_s5  ;;  %19 = sbr.rel (!%p17_p9) target bundleno = 9 (0x9), region = 85 }
  0xd2   :  { %349 = vsyncpa [#allocation3], 1 }
  0xd3   :  { %351 = vsyncpa [#allocation3 + $0x1], 1 }
  0xd4   :  { %352 = vsyncpa [#allocation6], 1 }
  0xd5   :  { %353 = vsyncpa [#allocation4], 1 }
  0xd6   :  { %355 = vsyncpa [#allocation4 + $0x1], 1 }

</bundles_post_ra>
